<compile_context>
chip_gen: v7x
topology: tpu7x:2x2x1
jax: 0.10.0
libtpu: 0.0.40
codegen_flags: <defaults>
</compile_context>

<pallas_src>
import functools
import numpy as np
import jax
import jax.numpy as jnp
from jax.experimental import pallas as pl
from jax.experimental.pallas import tpu as pltpu


# ----------------------------------------------------------------------------
# Static NATTEN index maps (dilation = 1, boundary-clamped windows)
# ----------------------------------------------------------------------------
def _natten_maps(H, W, K):
    """Neighbor flat indices (HW, KK) + rpb row/col gather indices (HW, KK)."""
    r = K // 2

    def win_start(i, L):
        s = max(i - r, 0)
        if i + r >= L:
            s += L - i - r - 1
        return s

    def pb_start(i, L):
        s = r
        if i < r:
            s += r - i
        if i + r >= L:
            s += L - i - 1 - r
        return s

    HW, KK = H * W, K * K
    nbr = np.zeros((HW, KK), np.int32)
    rpb_rows = np.zeros((HW, KK), np.int32)
    rpb_cols = np.zeros((HW, KK), np.int32)
    for i in range(H):
        wsi, pbi = win_start(i, H), pb_start(i, H)
        for j in range(W):
            wsj, pbj = win_start(j, W), pb_start(j, W)
            p = i * W + j
            for ki in range(K):
                for kj in range(K):
                    kk = ki * K + kj
                    nbr[p, kk] = (wsi + ki) * W + (wsj + kj)
                    rpb_rows[p, kk] = pbi + ki
                    rpb_cols[p, kk] = pbj + kj
    return nbr, rpb_rows, rpb_cols


def _default_vmem_limit():
    try:
        cap = getattr(pltpu.get_tpu_info(), "vmem_capacity_bytes", 128 * 1024 * 1024)
    except Exception:
        cap = 128 * 1024 * 1024
    # v7x has 64 MiB physical VMEM per TC -> stay well inside; v5e/v6e have 128 MiB.
    return (36 if cap <= 64 * 1024 * 1024 else 64) * 1024 * 1024


# ----------------------------------------------------------------------------
# Small Pallas kernels: masked patch embedding and LN + head (1x1 convs)
# ----------------------------------------------------------------------------
def _embed_kernel(x_ref, mask_ref, w_ref, b_ref, o_ref):
    xm = x_ref[...] * mask_ref[...]                       # checkerboard input mask
    o_ref[...] = jnp.dot(xm, w_ref[...], preferred_element_type=jnp.float32) + b_ref[...]


def _head_kernel(h_ref, g_ref, b_ref, w_ref, bias_ref, mask_ref, o_ref):
    h = h_ref[...]
    mu = jnp.mean(h, axis=-1, keepdims=True)
    d = h - mu
    var = jnp.mean(d * d, axis=-1, keepdims=True)
    n = d * jax.lax.rsqrt(var + 1e-5) * g_ref[...] + b_ref[...]
    y = jnp.dot(n, w_ref[...], preferred_element_type=jnp.float32) + bias_ref[...]
    o_ref[...] = y * mask_ref[...]                        # checkerboard output mask


# ----------------------------------------------------------------------------
# Fused NeighborhoodBlock stack: grid = (batch_blocks, num_layers)
#   - batch axis "parallel" (megacore / pipelining)
#   - layer axis "arbitrary"; the output block is VMEM-resident across layers
# ----------------------------------------------------------------------------
def _block_kernel(x_ref, bias_ref, wqkv_ref, wproj_ref, bproj_ref,
                  ln1g_ref, ln1b_ref, ln2g_ref, ln2b_ref,
                  w1_ref, b1_ref, w2_ref, b2_ref, out_ref, attn_ref, *,
                  bb, hw, num_heads, head_dim, scale, eps):
    C = num_heads * head_dim
    l = pl.program_id(1)

    # First layer step: seed the resident hidden state from the embedding block.
    @pl.when(l == 0)
    def _():
        out_ref[...] = x_ref[...]

    h = out_ref[...]                                      # (bb*hw, C), lives in VMEM across layers

    def layer_norm(v, g, b):
        mu = jnp.mean(v, axis=-1, keepdims=True)
        d = v - mu
        var = jnp.mean(d * d, axis=-1, keepdims=True)
        return d * jax.lax.rsqrt(var + eps) * g + b

    # ---- LayerNorm -> QKV over the whole (bb*hw) token dimension (fills MXU M) --
    n1 = layer_norm(h, ln1g_ref[...], ln1b_ref[...])
    qkv = jnp.dot(n1, wqkv_ref[...], preferred_element_type=jnp.float32)   # (bb*hw, 3C)

    # ---- Dense masked neighborhood attention --------------------------------
    # bias_ref[h] = rpb folded into a (hw, hw) additive bias, -1e9 outside the
    # boundary-clamped KxK window (exp underflows to exactly 0 -> identical to
    # the KK-window softmax of the reference).
    for b in range(bb):
        r0 = b * hw
        q = qkv[r0:r0 + hw, 0:C] * scale                  # (hw, C)
        k = qkv[r0:r0 + hw, C:2 * C]
        v = qkv[r0:r0 + hw, 2 * C:3 * C]
        for hh in range(num_heads):
            lo, hi = hh * head_dim, (hh + 1) * head_dim
            s = jax.lax.dot_general(                      # (hw, hw) = Q_h @ K_h^T  (MXU)
                q[:, lo:hi], k[:, lo:hi],
                dimension_numbers=(((1,), (1,)), ((), ())),
                preferred_element_type=jnp.float32)
            s = s + bias_ref[hh]
            m = jnp.max(s, axis=-1, keepdims=True)        # lane-dense row softmax
            e = jnp.exp(s - m)
            p = e / jnp.sum(e, axis=-1, keepdims=True)
            # AV on the MXU; store straight into the scratch rows/lanes (no concat)
            attn_ref[r0:r0 + hw, lo:hi] = jnp.dot(
                p, v[:, lo:hi], preferred_element_type=jnp.float32)

    attn = jnp.dot(attn_ref[...], wproj_ref[...],
                   preferred_element_type=jnp.float32) + bproj_ref[...]
    h1 = h + attn

    # ---- PreNorm + FeedForward (1x1 convs == per-pixel linear) -----------------
    n2 = layer_norm(h1, ln2g_ref[...], ln2b_ref[...])
    f = jnp.dot(n2, w1_ref[...], preferred_element_type=jnp.float32) + b1_ref[...]
    f = jnp.where(f > 0, f, 0.2 * f)                      # LeakyReLU(0.2)
    f = jnp.dot(f, w2_ref[...], preferred_element_type=jnp.float32) + b2_ref[...]

    out_ref[...] = h1 + f


def _fused_blocks(h_flat, bias_stack, stk, *, B, HW, num_heads,
                  batch_block, vmem_limit_bytes):
    C = h_flat.shape[1]
    head_dim = C // num_heads
    scale = head_dim ** -0.5
    L = bias_stack.shape[0]
    hidden = stk['w1'].shape[-1]
    bb = batch_block
    assert B % bb == 0
    nb = B // bb
    M = bb * HW

    kernel = functools.partial(
        _block_kernel, bb=bb, hw=HW, num_heads=num_heads, head_dim=head_dim,
        scale=scale, eps=1e-5)

    def layer_spec(arr):
        nd = arr.ndim
        return pl.BlockSpec((None,) + arr.shape[1:],
                            lambda g, l, _nd=nd: (l,) + (0,) * (_nd - 1))

    operands = (h_flat, bias_stack, stk['wqkv'], stk['wproj'], stk['bproj'],
                stk['ln1g'], stk['ln1b'], stk['ln2g'], stk['ln2b'],
                stk['w1'], stk['b1'], stk['w2'], stk['b2'])

    in_specs = ([pl.BlockSpec((M, C), lambda g, l: (g, 0))]
                + [layer_spec(a) for a in operands[1:]])

    flops = int(L * (2 * B * HW * C * 3 * C              # qkv
                     + 4 * B * HW * HW * C               # QK^T + PV over all heads
                     + 2 * B * HW * C * C                # proj
                     + 4 * B * HW * C * hidden))         # FFN
    bytes_accessed = int(sum(a.size * a.dtype.itemsize for a in operands)
                         + B * HW * C * 4)
    cost = pl.CostEstimate(flops=flops,
                           transcendentals=int(L * B * num_heads * HW * HW),
                           bytes_accessed=bytes_accessed)

    return pl.pallas_call(
        kernel,
        out_shape=jax.ShapeDtypeStruct((B * HW, C), jnp.float32),
        grid_spec=pltpu.PrefetchScalarGridSpec(
            num_scalar_prefetch=0,
            grid=(nb, L),
            in_specs=in_specs,
            out_specs=pl.BlockSpec((M, C), lambda g, l: (g, 0)),
            scratch_shapes=[pltpu.VMEM((M, C), jnp.float32)]),
        compiler_params=pltpu.CompilerParams(
            dimension_semantics=("parallel", "arbitrary"),
            vmem_limit_bytes=vmem_limit_bytes),
        cost_estimate=cost,
    )(*operands)


# ----------------------------------------------------------------------------
# Full TransDecoder forward (NCHW in / NCHW out)
# ----------------------------------------------------------------------------
def trans_decoder_forward(x_nchw, params, *, kernel_size, num_heads,
                          batch_block=None, vmem_limit_bytes=None):
    B, cin, H, W = x_nchw.shape
    C = params['embed_w'].shape[1]
    cout = params['head_w'].shape[1]
    HW = H * W
    # TODO(synk): implement the H/W < window_size pad/unpad path from the torch module.
    assert H >= kernel_size and W >= kernel_size

    # checkerboard masks (TransDecoder.get_mask, scan_mode='checkboard')
    ij = np.arange(H)[:, None] + np.arange(W)[None, :]
    checker = (ij % 2 == 1).astype(np.float32).reshape(HW, 1)
    in_mask = jnp.asarray(np.tile(checker, (B, 1)))
    out_mask = jnp.asarray(np.tile(1.0 - checker, (B, 1)))

    # One-time preprocessing: fold rpb + the boundary-clamped NATTEN window mask
    # into a dense per-layer (heads, HW, HW) additive bias (-1e9 outside window).
    # TODO(synk): for large feature maps (HW >> 256) switch to a pltpu.roll-based
    #             shifted-window path instead of dense (HW, HW) logits.
    nbr, rr, rc = _natten_maps(H, W, kernel_size)
    p_idx = np.arange(HW)[:, None]
    bias_stack = jnp.stack([
        jnp.full((num_heads, HW, HW), -1e9, jnp.float32)
           .at[:, p_idx, nbr].set(lp['rpb'][:, rr, rc])
        for lp in params['blocks']], axis=0)              # (L, heads, HW, HW)

    # Stacked per-layer weights -> single fused pallas_call over all layers.
    def stack(name):
        return jnp.stack([lp[name] for lp in params['blocks']], axis=0)
    stk = {k: stack(k) for k in ('wqkv', 'wproj', 'bproj', 'ln1g', 'ln1b',
                                 'ln2g', 'ln2b', 'w1', 'b1', 'w2', 'b2')}

    if vmem_limit_bytes is None:
        vmem_limit_bytes = _default_vmem_limit()
    if batch_block is None:
        # grid >= 2 (v7x megacore + pipelining) while keeping MXU M >= 128
        batch_block = B // 2 if (B % 2 == 0 and (B // 2) * HW >= 128) else B

    x_flat = jnp.transpose(x_nchw, (0, 2, 3, 1)).reshape(B * HW, cin)

    # masked patch embedding (1x1 conv)
    h = pl.pallas_call(
        _embed_kernel,
        out_shape=jax.ShapeDtypeStruct((B * HW, C), jnp.float32),
    )(x_flat, in_mask, params['embed_w'], params['embed_b'])

    # all NeighborhoodBlocks in one fused kernel (hidden state stays in VMEM)
    h = _fused_blocks(h, bias_stack, stk, B=B, HW=HW, num_heads=num_heads,
                      batch_block=batch_block, vmem_limit_bytes=vmem_limit_bytes)

    # LN + 1x1-conv head + output mask
    out = pl.pallas_call(
        _head_kernel,
        out_shape=jax.ShapeDtypeStruct((B * HW, cout), jnp.float32),
    )(h, params['headln_g'], params['headln_b'],
      params['head_w'], params['head_b'], out_mask)

    return jnp.transpose(out.reshape(B, H, W, cout), (0, 3, 1, 2))


# ----------------------------------------------------------------------------
# Pure-JAX reference (explicit KK-window gather formulation) for parity check
# ----------------------------------------------------------------------------
def _reference_transdecoder(x_nchw, params, *, kernel_size, num_heads):
    B, cin, H, W = x_nchw.shape
    C = params['embed_w'].shape[1]
    HW = H * W
    hd = C // num_heads
    scale = hd ** -0.5
    eps = 1e-5

    nbr, rr, rc = _natten_maps(H, W, kernel_size)
    ij = np.arange(H)[:, None] + np.arange(W)[None, :]
    checker = jnp.asarray((ij % 2 == 1).astype(np.float32).reshape(1, HW, 1))

    def ln(v, g, b):
        mu = v.mean(-1, keepdims=True)
        va = ((v - mu) ** 2).mean(-1, keepdims=True)
        return (v - mu) / jnp.sqrt(va + eps) * g + b

    x = jnp.transpose(x_nchw, (0, 2, 3, 1)).reshape(B, HW, cin)
    x = x * checker
    h = x @ params['embed_w'] + params['embed_b']

    for lp in params['blocks']:
        rpb_g = lp['rpb'][:, rr, rc]                      # (heads, HW, KK)
        n1 = ln(h, lp['ln1g'], lp['ln1b'])
        qkv = n1 @ lp['wqkv']
        q = qkv[..., :C].reshape(B, HW, num_heads, hd) * scale
        k = qkv[..., C:2 * C].reshape(B, HW, num_heads, hd)
        v = qkv[..., 2 * C:].reshape(B, HW, num_heads, hd)
        gk = k[:, nbr]                                    # (B, HW, KK, heads, hd)
        gv = v[:, nbr]
        logits = jnp.einsum('bphd,bpkhd->bhpk', q, gk) + rpb_g[None]
        p = jax.nn.softmax(logits, axis=-1)
        o = jnp.einsum('bhpk,bpkhd->bphd', p, gv).reshape(B, HW, C)
        attn = o @ lp['wproj'] + lp['bproj']
        h1 = h + attn
        n2 = ln(h1, lp['ln2g'], lp['ln2b'])
        f = n2 @ lp['w1'] + lp['b1']
        f = jnp.where(f > 0, f, 0.2 * f)
        f = f @ lp['w2'] + lp['b2']
        h = h1 + f

    n = ln(h, params['headln_g'], params['headln_b'])
    out = n @ params['head_w'] + params['head_b']
    out = out * (1.0 - checker)
    return jnp.transpose(out.reshape(B, H, W, -1), (0, 3, 1, 2))


# ----------------------------------------------------------------------------
# Main
# ----------------------------------------------------------------------------
if __name__ == "__main__":
    # Scaled-down TransDecoder config: dim=128, head_dim=64 (module's dim_head),
    # 2 heads, mlp_ratio=4, kernel_size=7, 2 layers, checkerboard masking, cin=cout=4.
    B, cin, cout, H, W = 2, 4, 4, 16, 16
    dim, num_heads, mlp_ratio, kernel_size, num_layers = 128, 2, 4, 7, 2
    hidden = dim * mlp_ratio

    key = jax.random.PRNGKey(0)
    keys = iter(jax.random.split(key, 64))

    def rnd(shape, s):
        return jax.random.normal(next(keys), shape, jnp.float32) * s

    params = {
        'embed_w': rnd((cin, dim), 1.0 / np.sqrt(cin)),
        'embed_b': rnd((1, dim), 0.02),
        'headln_g': 1.0 + rnd((1, dim), 0.05),
        'headln_b': rnd((1, dim), 0.05),
        'head_w': rnd((dim, cout), 1.0 / np.sqrt(dim)),
        'head_b': rnd((1, cout), 0.02),
        'blocks': [],
    }
    for _ in range(num_layers):
        params['blocks'].append({
            'wqkv': rnd((dim, 3 * dim), 1.0 / np.sqrt(dim)),
            'wproj': rnd((dim, dim), 1.0 / np.sqrt(dim)),
            'bproj': rnd((1, dim), 0.02),
            'ln1g': 1.0 + rnd((1, dim), 0.05),
            'ln1b': rnd((1, dim), 0.05),
            'ln2g': 1.0 + rnd((1, dim), 0.05),
            'ln2b': rnd((1, dim), 0.05),
            'w1': rnd((dim, hidden), 1.0 / np.sqrt(dim)),
            'b1': rnd((1, hidden), 0.02),
            'w2': rnd((hidden, dim), 1.0 / np.sqrt(hidden)),
            'b2': rnd((1, dim), 0.02),
            # rpb ~ trunc_normal(std=0.02, a=-2, b=2)
            'rpb': jax.random.truncated_normal(
                next(keys), -2.0, 2.0,
                (num_heads, 2 * kernel_size - 1, 2 * kernel_size - 1),
                jnp.float32) * 0.02,
        })

    x = jax.random.normal(next(keys), (B, cin, H, W), jnp.float32)

    out = trans_decoder_forward(x, params, kernel_size=kernel_size, num_heads=num_heads)
    out = jax.block_until_ready(out)

    with jax.default_matmul_precision("highest"):
        ref = jax.block_until_ready(
            _reference_transdecoder(x, params, kernel_size=kernel_size,
                                    num_heads=num_heads))

    np.testing.assert_allclose(np.asarray(out), np.asarray(ref), rtol=1e-3, atol=1e-3)
    print("KERNEL_OK")
</pallas_src>

<mosaic_0001>
module attributes {stable_mosaic.version = 11 : i64} {
  func.func @_embed_kernel(%arg0: memref<512x4xf32, #tpu.memory_space<vmem>>, %arg1: memref<512x1xf32, #tpu.memory_space<vmem>>, %arg2: memref<4x128xf32, #tpu.memory_space<vmem>>, %arg3: memref<1x128xf32, #tpu.memory_space<vmem>>, %arg4: memref<512x128xf32, #tpu.memory_space<vmem>>) attributes {dimension_semantics = [], scalar_prefetch = 0 : i64, scratch_operands = 0 : i64, tpu.core_type = #tpu.core_type<tc>} {
    %c0 = arith.constant 0 : index
    %c0_0 = arith.constant 0 : index
    %0 = vector.load %arg0[%c0, %c0_0] : memref<512x4xf32, #tpu.memory_space<vmem>>, vector<512x4xf32>
    %c0_1 = arith.constant 0 : index
    %c0_2 = arith.constant 0 : index
    %1 = vector.load %arg1[%c0_1, %c0_2] : memref<512x1xf32, #tpu.memory_space<vmem>>, vector<512x1xf32>
    %2 = vector.broadcast %1 : vector<512x1xf32> to vector<512x4xf32>
    %3 = arith.mulf %0, %2 : vector<512x4xf32>
    %c0_3 = arith.constant 0 : index
    %c0_4 = arith.constant 0 : index
    %4 = vector.load %arg2[%c0_3, %c0_4] : memref<4x128xf32, #tpu.memory_space<vmem>>, vector<4x128xf32>
    %cst = arith.constant dense<0.000000e+00> : vector<512x128xf32>
    %5 = tpu.matmul %3, %4, %cst {dimension_numbers = #tpu.dot_dimension_numbers<[1], [0], [0], [1], [0, 0, 1, 1], [], []>} : vector<512x4xf32>, vector<4x128xf32>, vector<512x128xf32> -> vector<512x128xf32>
    %c0_5 = arith.constant 0 : index
    %c0_6 = arith.constant 0 : index
    %6 = vector.load %arg3[%c0_5, %c0_6] : memref<1x128xf32, #tpu.memory_space<vmem>>, vector<1x128xf32>
    %7 = vector.broadcast %6 : vector<1x128xf32> to vector<512x128xf32>
    %8 = arith.addf %5, %7 : vector<512x128xf32>
    %c0_7 = arith.constant 0 : index
    %c0_8 = arith.constant 0 : index
    %9 = vector.load %arg4[%c0_7, %c0_8] : memref<512x128xf32, #tpu.memory_space<vmem>>, vector<512x128xf32>
    tpu.vector_store %arg4[%c0_7, %c0_8], %8 {strides = array<i32>} : memref<512x128xf32, #tpu.memory_space<vmem>>, vector<512x128xf32>,
    return
  }
}

</mosaic_0001>

<bundles_post_ra>
// kernel: tpu_custom_call.1
= control target key start
LH: loop header
LB: loop body
LE: loop exit
PB: predicated region body
PF: predicated region fallthrough
CT: control target
= control target key end

     0   :  { %v1461_v2 = vmov 0   ;;  %vm731_vm0 = vcmask 1043456   ;;  %s2022_s0 = inlined_call_operand.vmem [shape: f32[512,4], index: 0, kind: input, shape index: {}]   ;;  %s2023_s1 = inlined_call_operand.vmem [shape: f32[512,1], index: 1, kind: input, shape index: {}]   ;;  %s2024_s2 = inlined_call_operand.vmem [shape: f32[4,128], index: 2, kind: input, shape index: {}]   ;;  %s2025_s3 = inlined_call_operand.vmem [shape: f32[1,128], index: 3, kind: input, shape index: {}]   ;;  %s2026_s4 = inlined_call_operand.hbm [shape: f32[512,128], index: 4, kind: output, shape index: {}]  }
   0x1   :  { %v83_v0 = vld [vmem:[%s2023_s1 + $0x8] sm:$0xff]  ;;  %v82_v1 = vld [vmem:[%s2023_s1] sm:$0xff]  ;;  %1436 = vset.pattern.permute.xlu1 %v1461_v2  ;;  %1435 = vset.pattern.permute.xlu0 %v1461_v2  ;;  %v116_v5 = vld [vmem:[%s2023_s1 + $0x110] sm:$0xff] }
   0x2   :  { %153 = vperm.xlu1 %1436, %v83_v0   ;;  %148 = vperm.xlu0 %1435, %v82_v1   ;;  %v115_v3 = vld [vmem:[%s2023_s1 + $0x108] sm:$0xff]  ;;  %v114_v4 = vld [vmem:[%s2023_s1 + $0x100] sm:$0xff]  ;;  %v84_v6 = vld [vmem:[%s2023_s1 + $0x10] sm:$0xff] }
   0x3   :  { %v117_v7 = vld [vmem:[%s2023_s1 + $0x118] sm:$0xff]  ;;  %v118_v9 = vld [vmem:[%s2023_s1 + $0x120] sm:$0xff]  ;;  %v119_v11 = vld [vmem:[%s2023_s1 + $0x128] sm:$0xff] }
   0x4   :  { %v85_v8 = vld [vmem:[%s2023_s1 + $0x18] sm:$0xff]  ;;  %v86_v10 = vld [vmem:[%s2023_s1 + $0x20] sm:$0xff]  ;;  %v87_v12 = vld [vmem:[%s2023_s1 + $0x28] sm:$0xff] }
   0x5   :  { %v530_v13 = vld [vmem:[%s2024_s2] sm:$0xf]  ;;  %v120_v14 = vld [vmem:[%s2023_s1 + $0x130] sm:$0xff] }
   0x6   :  { %313 = vperm.xlu1 %1436, %v115_v3   ;;  %308 = vperm.xlu0 %1435, %v114_v4   ;;  %v88_v15 = vld [vmem:[%s2023_s1 + $0x30] sm:$0xff] }
   0x7   :  { %1331 = vmatprep.subr.msk.mxu0 %vm731_vm0, %v530_v13  ;;  %1429 = vmatprep.subr.msk.mxu1 %vm731_vm0, %v530_v13 }
   0x8   :  { %1332 = vmatpush3.msk.msra.mxu0 %vm731_vm0, %v530_v13  ;;  %1430 = vmatpush3.msk.msra.mxu1 %vm731_vm0, %v530_v13 }
   0xa   :  { %318 = vperm.xlu1 %1436, %v116_v5   ;;  %158 = vperm.xlu0 %1435, %v84_v6  }
   0xe   :  { %323 = vperm.xlu1 %1436, %v117_v7   ;;  %163 = vperm.xlu0 %1435, %v85_v8  }
  0x12   :  { %328 = vperm.xlu1 %1436, %v118_v9   ;;  %168 = vperm.xlu0 %1435, %v86_v10  }
  0x16   :  { %333 = vperm.xlu1 %1436, %v119_v11   ;;  %173 = vperm.xlu0 %1435, %v87_v12  }
  0x1a   :  { %338 = vperm.xlu1 %1436, %v120_v14   ;;  %178 = vperm.xlu0 %1435, %v88_v15  }
  0x1b   :  { %9 = vsyncpa [#allocation3], 0  ;;  %v121_v16 = vld [vmem:[%s2023_s1 + $0x138] sm:$0xff]  ;;  %v122_v18 = vld [vmem:[%s2023_s1 + $0x140] sm:$0xff]  ;;  %vm538_vm1 = vcmask 31744  }
  0x1c   :  { %v89_v17 = vld [vmem:[%s2023_s1 + $0x38] sm:$0xff]  ;;  %v90_v19 = vld [vmem:[%s2023_s1 + $0x40] sm:$0xff]  ;;  %v123_v20 = vld [vmem:[%s2023_s1 + $0x148] sm:$0xff] }
  0x1d   :  { %v91_v21 = vld [vmem:[%s2023_s1 + $0x48] sm:$0xff]  ;;  %v124_v22 = vld [vmem:[%s2023_s1 + $0x150] sm:$0xff]  ;;  %v125_v24 = vld [vmem:[%s2023_s1 + $0x158] sm:$0xff] }
  0x1e   :  { %343 = vperm.xlu1 %1436, %v121_v16   ;;  %183 = vperm.xlu0 %1435, %v89_v17   ;;  %v92_v23 = vld [vmem:[%s2023_s1 + $0x50] sm:$0xff]  ;;  %v93_v25 = vld [vmem:[%s2023_s1 + $0x58] sm:$0xff]  ;;  %v126_v26 = vld [vmem:[%s2023_s1 + $0x160] sm:$0xff] }
  0x1f   :  { %v94_v27 = vld [vmem:[%s2023_s1 + $0x60] sm:$0xff]  ;;  %v127_v28 = vld [vmem:[%s2023_s1 + $0x168] sm:$0xff]  ;;  %v128_v30 = vld [vmem:[%s2023_s1 + $0x170] sm:$0xff] }
  0x20   :  { %v95_v29 = vld [vmem:[%s2023_s1 + $0x68] sm:$0xff]  ;;  %v96_v31 = vld [vmem:[%s2023_s1 + $0x70] sm:$0xff]  ;;  %v129_v32 = vld [vmem:[%s2023_s1 + $0x178] sm:$0xff] }
  0x21   :  { %v97_v33 = vld [vmem:[%s2023_s1 + $0x78] sm:$0xff]  ;;  %v130_v34 = vld [vmem:[%s2023_s1 + $0x180] sm:$0xff]  ;;  %v131_v36 = vld [vmem:[%s2023_s1 + $0x188] sm:$0xff] }
  0x22   :  { %348 = vperm.xlu1 %1436, %v122_v18   ;;  %188 = vperm.xlu0 %1435, %v90_v19   ;;  %v98_v35 = vld [vmem:[%s2023_s1 + $0x80] sm:$0xff]  ;;  %v99_v37 = vld [vmem:[%s2023_s1 + $0x88] sm:$0xff]  ;;  %v132_v38 = vld [vmem:[%s2023_s1 + $0x190] sm:$0xff] }
  0x23   :  { %v100_v39 = vld [vmem:[%s2023_s1 + $0x90] sm:$0xff]  ;;  %v133_v40 = vld [vmem:[%s2023_s1 + $0x198] sm:$0xff]  ;;  %v134_v42 = vld [vmem:[%s2023_s1 + $0x1a0] sm:$0xff] }
  0x24   :  { %v101_v41 = vld [vmem:[%s2023_s1 + $0x98] sm:$0xff]  ;;  %v102_v43 = vld [vmem:[%s2023_s1 + $0xa0] sm:$0xff]  ;;  %v135_v44 = vld [vmem:[%s2023_s1 + $0x1a8] sm:$0xff] }
  0x25   :  { %v103_v45 = vld [vmem:[%s2023_s1 + $0xa8] sm:$0xff]  ;;  %v136_v46 = vld [vmem:[%s2023_s1 + $0x1b0] sm:$0xff]  ;;  %v137_v48 = vld [vmem:[%s2023_s1 + $0x1b8] sm:$0xff] }
  0x26   :  { %353 = vperm.xlu1 %1436, %v123_v20   ;;  %193 = vperm.xlu0 %1435, %v91_v21   ;;  %v104_v47 = vld [vmem:[%s2023_s1 + $0xb0] sm:$0xff]  ;;  %v105_v49 = vld [vmem:[%s2023_s1 + $0xb8] sm:$0xff]  ;;  %v138_v50 = vld [vmem:[%s2023_s1 + $0x1c0] sm:$0xff] }
  0x27   :  { %v106_v51 = vld [vmem:[%s2023_s1 + $0xc0] sm:$0xff]  ;;  %v139_v52 = vld [vmem:[%s2023_s1 + $0x1c8] sm:$0xff]  ;;  %v140_v54 = vld [vmem:[%s2023_s1 + $0x1d0] sm:$0xff] }
  0x28   :  { %v107_v53 = vld [vmem:[%s2023_s1 + $0xc8] sm:$0xff]  ;;  %v108_v55 = vld [vmem:[%s2023_s1 + $0xd0] sm:$0xff]  ;;  %v141_v56 = vld [vmem:[%s2023_s1 + $0x1d8] sm:$0xff] }
  0x29   :  { %v109_v57 = vld [vmem:[%s2023_s1 + $0xd8] sm:$0xff]  ;;  %v142_v58 = vld [vmem:[%s2023_s1 + $0x1e0] sm:$0xff]  ;;  %v143_v60 = vld [vmem:[%s2023_s1 + $0x1e8] sm:$0xff] }
  0x2a   :  { %358 = vperm.xlu1 %1436, %v124_v22   ;;  %198 = vperm.xlu0 %1435, %v92_v23   ;;  %v110_v59 = vld [vmem:[%s2023_s1 + $0xe0] sm:$0xff]  ;;  %v111_v61 = vld [vmem:[%s2023_s1 + $0xe8] sm:$0xff]  ;;  %v144_v62 = vld [vmem:[%s2023_s1 + $0x1f0] sm:$0xff] }
  0x2b   :  { %v112_v63 = vld [vmem:[%s2023_s1 + $0xf0] sm:$0xff]  ;;  %v145_v0 = vld [vmem:[%s2023_s1 + $0x1f8] sm:$0xff]  ;;  %v19_v2 = vld [vmem:[%s2022_s0 + $0x8] sm:$0xff] }
  0x2c   :  { %v113_v1 = vld [vmem:[%s2023_s1 + $0xf8] sm:$0xff]  ;;  %v18_v3 = vld [vmem:[%s2022_s0] sm:$0xff]  ;;  %v51_v8 = vld [vmem:[%s2022_s0 + $0x108] sm:$0xff] }
  0x2d   :  { %v50_v9 = vld [vmem:[%s2022_s0 + $0x100] sm:$0xff]  ;;  %v52_v14 = vld [vmem:[%s2022_s0 + $0x110] sm:$0xff]  ;;  %v53_v20 = vld [vmem:[%s2022_s0 + $0x118] sm:$0xff] }
  0x2e   :  { %363 = vperm.xlu1 %1436, %v125_v24   ;;  %203 = vperm.xlu0 %1435, %v93_v25   ;;  %v20_v15 = vld [vmem:[%s2022_s0 + $0x10] sm:$0xff]  ;;  %v21_v21 = vld [vmem:[%s2022_s0 + $0x18] sm:$0xff] }
  0x32   :  { %368 = vperm.xlu1 %1436, %v126_v26   ;;  %208 = vperm.xlu0 %1435, %v94_v27   ;;  %v54_v26 = vld [vmem:[%s2022_s0 + $0x120] sm:$0xff] }
  0x33   :  { %v22_v27 = vld [vmem:[%s2022_s0 + $0x20] sm:$0xff] }
  0x36   :  { %373 = vperm.xlu1 %1436, %v127_v28   ;;  %213 = vperm.xlu0 %1435, %v95_v29  }
  0x3a   :  { %378 = vperm.xlu1 %1436, %v128_v30   ;;  %218 = vperm.xlu0 %1435, %v96_v31  }
  0x3e   :  { %383 = vperm.xlu1 %1436, %v129_v32   ;;  %223 = vperm.xlu0 %1435, %v97_v33   ;;  %v55_v32 = vld [vmem:[%s2022_s0 + $0x128] sm:$0xff] }
  0x3f   :  { %v23_v33 = vld [vmem:[%s2022_s0 + $0x28] sm:$0xff] }
  0x42   :  { %388 = vperm.xlu1 %1436, %v130_v34   ;;  %228 = vperm.xlu0 %1435, %v98_v35  }
  0x46   :  { %393 = vperm.xlu1 %1436, %v131_v36   ;;  %233 = vperm.xlu0 %1435, %v99_v37  }
  0x4a   :  { %398 = vperm.xlu1 %1436, %v132_v38   ;;  %238 = vperm.xlu0 %1435, %v100_v39   ;;  %v56_v38 = vld [vmem:[%s2022_s0 + $0x130] sm:$0xff] }
  0x4b   :  { %v24_v39 = vld [vmem:[%s2022_s0 + $0x30] sm:$0xff] }
  0x4e   :  { %403 = vperm.xlu1 %1436, %v133_v40   ;;  %243 = vperm.xlu0 %1435, %v101_v41  }
  0x52   :  { %408 = vperm.xlu1 %1436, %v134_v42   ;;  %248 = vperm.xlu0 %1435, %v102_v43  }
  0x56   :  { %413 = vperm.xlu1 %1436, %v135_v44   ;;  %253 = vperm.xlu0 %1435, %v103_v45   ;;  %v57_v44 = vld [vmem:[%s2022_s0 + $0x138] sm:$0xff] }
  0x57   :  { %v25_v45 = vld [vmem:[%s2022_s0 + $0x38] sm:$0xff] }
  0x5a   :  { %418 = vperm.xlu1 %1436, %v136_v46   ;;  %258 = vperm.xlu0 %1435, %v104_v47  }
  0x5e   :  { %423 = vperm.xlu1 %1436, %v137_v48   ;;  %263 = vperm.xlu0 %1435, %v105_v49  }
  0x62   :  { %428 = vperm.xlu1 %1436, %v138_v50   ;;  %268 = vperm.xlu0 %1435, %v106_v51   ;;  %v58_v50 = vld [vmem:[%s2022_s0 + $0x140] sm:$0xff] }
  0x63   :  { %v26_v51 = vld [vmem:[%s2022_s0 + $0x40] sm:$0xff] }
  0x66   :  { %433 = vperm.xlu1 %1436, %v139_v52   ;;  %273 = vperm.xlu0 %1435, %v107_v53  }
  0x6a   :  { %438 = vperm.xlu1 %1436, %v140_v54   ;;  %278 = vperm.xlu0 %1435, %v108_v55  }
  0x6e   :  { %443 = vperm.xlu1 %1436, %v141_v56   ;;  %283 = vperm.xlu0 %1435, %v109_v57   ;;  %v59_v56 = vld [vmem:[%s2022_s0 + $0x148] sm:$0xff] }
  0x6f   :  { %v27_v57 = vld [vmem:[%s2022_s0 + $0x48] sm:$0xff] }
  0x72   :  { %448 = vperm.xlu1 %1436, %v142_v58   ;;  %288 = vperm.xlu0 %1435, %v110_v59  }
  0x76   :  { %453 = vperm.xlu1 %1436, %v143_v60   ;;  %293 = vperm.xlu0 %1435, %v111_v61  }
  0x7a   :  { %458 = vperm.xlu1 %1436, %v144_v62   ;;  %298 = vperm.xlu0 %1435, %v112_v63   ;;  %v60_v62 = vld [vmem:[%s2022_s0 + $0x150] sm:$0xff] }
  0x7b   :  { %v28_v63 = vld [vmem:[%s2022_s0 + $0x50] sm:$0xff] }
  0x7e   :  { %463 = vperm.xlu1 %1436, %v145_v0   ;;  %303 = vperm.xlu0 %1435, %v113_v1  }
  0x81   :  { %v154_v4 = vpop.permute.xlu1 %153  ;;  %v149_v5 = vpop.permute.xlu0 %148 }
  0x82   :  { %v467_v6 = vmul.f32 %v154_v4, %v19_v2  ;;  %v466_v7 = vmul.f32 %v149_v5, %v18_v3  ;;  %v61_v4 = vld [vmem:[%s2022_s0 + $0x158] sm:$0xff] }
  0x83   :  { %v29_v5 = vld [vmem:[%s2022_s0 + $0x58] sm:$0xff] }
  0x84   :  { %1333 = vmatprep.mubr.msk.f32.mxu0 %vm538_vm1, %v466_v7 }
  0x85   :  { %v314_v10 = vpop.permute.xlu1 %313  ;;  %v309_v11 = vpop.permute.xlu0 %308  ;;  %1334 = vmatmul.mubr.msk.f32.vlgmr.msra.gmra.mrb[0].mxu0 %vm538_vm1, %v467_v6 }
  0x86   :  { %v499_v12 = vmul.f32 %v314_v10, %v51_v8  ;;  %v498_v13 = vmul.f32 %v309_v11, %v50_v9  ;;  %v62_v10 = vld [vmem:[%s2022_s0 + $0x160] sm:$0xff] }
  0x87   :  { %v30_v11 = vld [vmem:[%s2022_s0 + $0x60] sm:$0xff] }
  0x88   :  { %1381 = vmatprep.mubr.msk.f32.mxu1 %vm538_vm1, %v498_v13 }
  0x89   :  { %v319_v16 = vpop.permute.xlu1 %318  ;;  %v159_v17 = vpop.permute.xlu0 %158  ;;  %1382 = vmatmul.mubr.msk.f32.vlgmr.msra.gmra.mrb[0].mxu1 %vm538_vm1, %v499_v12 }
  0x8a   :  { %v500_v18 = vmul.f32 %v319_v16, %v52_v14  ;;  %v468_v19 = vmul.f32 %v159_v17, %v20_v15  ;;  %v63_v16 = vld [vmem:[%s2022_s0 + $0x168] sm:$0xff] }
  0x8b   :  { %v31_v17 = vld [vmem:[%s2022_s0 + $0x68] sm:$0xff] }
  0x8c   :  { %1336 = vmatprep.mubr.msk.f32.mxu0 %vm538_vm1, %v468_v19  ;;  %1384 = vmatprep.mubr.msk.f32.mxu1 %vm538_vm1, %v500_v18 }
  0x8d   :  { %v324_v22 = vpop.permute.xlu1 %323  ;;  %v164_v23 = vpop.permute.xlu0 %163 }
  0x8e   :  { %v501_v24 = vmul.f32 %v324_v22, %v53_v20  ;;  %v469_v25 = vmul.f32 %v164_v23, %v21_v21  ;;  %v64_v22 = vld [vmem:[%s2022_s0 + $0x170] sm:$0xff] }
  0x8f   :  { %v32_v23 = vld [vmem:[%s2022_s0 + $0x70] sm:$0xff] }
  0x90   :  { %1337 = vmatmul.mubr.msk.f32.gmra.mrb[2].mxu0 %vm538_vm1, %v469_v25  ;;  %1385 = vmatmul.mubr.msk.f32.gmra.mrb[2].mxu1 %vm538_vm1, %v501_v24 }
  0x91   :  { %v329_v28 = vpop.permute.xlu1 %328  ;;  %v169_v29 = vpop.permute.xlu0 %168 }
  0x92   :  { %v502_v30 = vmul.f32 %v329_v28, %v54_v26  ;;  %v470_v31 = vmul.f32 %v169_v29, %v22_v27  ;;  %v65_v28 = vld [vmem:[%s2022_s0 + $0x178] sm:$0xff] }
  0x93   :  { %v33_v29 = vld [vmem:[%s2022_s0 + $0x78] sm:$0xff] }
  0x94   :  { %1339 = vmatprep.mubr.msk.f32.mxu0 %vm538_vm1, %v470_v31  ;;  %1387 = vmatprep.mubr.msk.f32.mxu1 %vm538_vm1, %v502_v30 }
  0x95   :  { %v334_v34 = vpop.permute.xlu1 %333  ;;  %v174_v35 = vpop.permute.xlu0 %173 }
  0x96   :  { %v503_v36 = vmul.f32 %v334_v34, %v55_v32  ;;  %v471_v37 = vmul.f32 %v174_v35, %v23_v33  ;;  %v66_v34 = vld [vmem:[%s2022_s0 + $0x180] sm:$0xff] }
  0x97   :  { %v34_v35 = vld [vmem:[%s2022_s0 + $0x80] sm:$0xff] }
  0x98   :  { %1340 = vmatmul.mubr.msk.f32.gmra.mrb[4].mxu0 %vm538_vm1, %v471_v37  ;;  %1388 = vmatmul.mubr.msk.f32.gmra.mrb[4].mxu1 %vm538_vm1, %v503_v36 }
  0x99   :  { %v339_v40 = vpop.permute.xlu1 %338  ;;  %v179_v41 = vpop.permute.xlu0 %178 }
  0x9a   :  { %v504_v42 = vmul.f32 %v339_v40, %v56_v38  ;;  %v472_v43 = vmul.f32 %v179_v41, %v24_v39  ;;  %v67_v40 = vld [vmem:[%s2022_s0 + $0x188] sm:$0xff] }
  0x9b   :  { %v35_v41 = vld [vmem:[%s2022_s0 + $0x88] sm:$0xff] }
  0x9c   :  { %1342 = vmatprep.mubr.msk.f32.mxu0 %vm538_vm1, %v472_v43  ;;  %1390 = vmatprep.mubr.msk.f32.mxu1 %vm538_vm1, %v504_v42 }
  0x9d   :  { %v344_v46 = vpop.permute.xlu1 %343  ;;  %v184_v47 = vpop.permute.xlu0 %183 }
  0x9e   :  { %v505_v48 = vmul.f32 %v344_v46, %v57_v44  ;;  %v473_v49 = vmul.f32 %v184_v47, %v25_v45  ;;  %v68_v46 = vld [vmem:[%s2022_s0 + $0x190] sm:$0xff] }
  0x9f   :  { %v36_v47 = vld [vmem:[%s2022_s0 + $0x90] sm:$0xff] }
  0xa0   :  { %1343 = vmatmul.mubr.msk.f32.gmra.mrb[6].mxu0 %vm538_vm1, %v473_v49  ;;  %1391 = vmatmul.mubr.msk.f32.gmra.mrb[6].mxu1 %vm538_vm1, %v505_v48 }
  0xa1   :  { %v349_v52 = vpop.permute.xlu1 %348  ;;  %v189_v53 = vpop.permute.xlu0 %188 }
  0xa2   :  { %v506_v54 = vmul.f32 %v349_v52, %v58_v50  ;;  %v474_v55 = vmul.f32 %v189_v53, %v26_v51  ;;  %v69_v52 = vld [vmem:[%s2022_s0 + $0x198] sm:$0xff] }
  0xa3   :  { %v37_v53 = vld [vmem:[%s2022_s0 + $0x98] sm:$0xff] }
  0xa4   :  { %1345 = vmatprep.mubr.msk.f32.mxu0 %vm538_vm1, %v474_v55  ;;  %1393 = vmatprep.mubr.msk.f32.mxu1 %vm538_vm1, %v506_v54 }
  0xa5   :  { %v354_v58 = vpop.permute.xlu1 %353  ;;  %v194_v59 = vpop.permute.xlu0 %193 }
  0xa6   :  { %v507_v60 = vmul.f32 %v354_v58, %v59_v56  ;;  %v475_v61 = vmul.f32 %v194_v59, %v27_v57  ;;  %v70_v58 = vld [vmem:[%s2022_s0 + $0x1a0] sm:$0xff] }
  0xa7   :  { %v38_v59 = vld [vmem:[%s2022_s0 + $0xa0] sm:$0xff] }
  0xa8   :  { %1346 = vmatmul.mubr.msk.f32.gmra.mrb[8].mxu0 %vm538_vm1, %v475_v61  ;;  %1394 = vmatmul.mubr.msk.f32.gmra.mrb[8].mxu1 %vm538_vm1, %v507_v60 }
  0xa9   :  { %v359_v0 = vpop.permute.xlu1 %358  ;;  %v199_v1 = vpop.permute.xlu0 %198 }
  0xaa   :  { %v508_v2 = vmul.f32 %v359_v0, %v60_v62  ;;  %v476_v3 = vmul.f32 %v199_v1, %v28_v63  ;;  %v71_v0 = vld [vmem:[%s2022_s0 + $0x1a8] sm:$0xff] }
  0xab   :  { %v39_v1 = vld [vmem:[%s2022_s0 + $0xa8] sm:$0xff] }
  0xac   :  { %1348 = vmatprep.mubr.msk.f32.mxu0 %vm538_vm1, %v476_v3  ;;  %1396 = vmatprep.mubr.msk.f32.mxu1 %vm538_vm1, %v508_v2 }
  0xad   :  { %v364_v6 = vpop.permute.xlu1 %363  ;;  %v204_v7 = vpop.permute.xlu0 %203 }
  0xae   :  { %v509_v8 = vmul.f32 %v364_v6, %v61_v4  ;;  %v477_v9 = vmul.f32 %v204_v7, %v29_v5  ;;  %v72_v6 = vld [vmem:[%s2022_s0 + $0x1b0] sm:$0xff] }
  0xaf   :  { %v40_v7 = vld [vmem:[%s2022_s0 + $0xb0] sm:$0xff] }
  0xb0   :  { %1349 = vmatmul.mubr.msk.f32.gmra.mrb[10].mxu0 %vm538_vm1, %v477_v9  ;;  %1397 = vmatmul.mubr.msk.f32.gmra.mrb[10].mxu1 %vm538_vm1, %v509_v8 }
  0xb1   :  { %v369_v12 = vpop.permute.xlu1 %368  ;;  %v209_v13 = vpop.permute.xlu0 %208 }
  0xb2   :  { %v510_v14 = vmul.f32 %v369_v12, %v62_v10  ;;  %v478_v15 = vmul.f32 %v209_v13, %v30_v11  ;;  %v73_v12 = vld [vmem:[%s2022_s0 + $0x1b8] sm:$0xff] }
  0xb3   :  { %v41_v13 = vld [vmem:[%s2022_s0 + $0xb8] sm:$0xff] }
  0xb4   :  { %1351 = vmatprep.mubr.msk.f32.mxu0 %vm538_vm1, %v478_v15  ;;  %1399 = vmatprep.mubr.msk.f32.mxu1 %vm538_vm1, %v510_v14 }
  0xb5   :  { %v374_v18 = vpop.permute.xlu1 %373  ;;  %v214_v19 = vpop.permute.xlu0 %213 }
  0xb6   :  { %v511_v20 = vmul.f32 %v374_v18, %v63_v16  ;;  %v479_v21 = vmul.f32 %v214_v19, %v31_v17  ;;  %v74_v18 = vld [vmem:[%s2022_s0 + $0x1c0] sm:$0xff] }
  0xb7   :  { %v42_v19 = vld [vmem:[%s2022_s0 + $0xc0] sm:$0xff] }
  0xb8   :  { %1352 = vmatmul.mubr.msk.f32.gmra.mrb[12].mxu0 %vm538_vm1, %v479_v21  ;;  %1400 = vmatmul.mubr.msk.f32.gmra.mrb[12].mxu1 %vm538_vm1, %v511_v20 }
  0xb9   :  { %v379_v24 = vpop.permute.xlu1 %378  ;;  %v219_v25 = vpop.permute.xlu0 %218 }
  0xba   :  { %v512_v26 = vmul.f32 %v379_v24, %v64_v22  ;;  %v480_v27 = vmul.f32 %v219_v25, %v32_v23  ;;  %v75_v24 = vld [vmem:[%s2022_s0 + $0x1c8] sm:$0xff] }
  0xbb   :  { %v43_v25 = vld [vmem:[%s2022_s0 + $0xc8] sm:$0xff] }
  0xbc   :  { %1354 = vmatprep.mubr.msk.f32.mxu0 %vm538_vm1, %v480_v27  ;;  %1402 = vmatprep.mubr.msk.f32.mxu1 %vm538_vm1, %v512_v26 }
  0xbd   :  { %v384_v30 = vpop.permute.xlu1 %383  ;;  %v224_v31 = vpop.permute.xlu0 %223 }
  0xbe   :  { %v513_v32 = vmul.f32 %v384_v30, %v65_v28  ;;  %v481_v33 = vmul.f32 %v224_v31, %v33_v29  ;;  %v76_v30 = vld [vmem:[%s2022_s0 + $0x1d0] sm:$0xff] }
  0xbf   :  { %v44_v31 = vld [vmem:[%s2022_s0 + $0xd0] sm:$0xff] }
  0xc0   :  { %1355 = vmatmul.mubr.msk.f32.gmra.mrb[14].mxu0 %vm538_vm1, %v481_v33  ;;  %1403 = vmatmul.mubr.msk.f32.gmra.mrb[14].mxu1 %vm538_vm1, %v513_v32 }
  0xc1   :  { %v389_v36 = vpop.permute.xlu1 %388  ;;  %v229_v37 = vpop.permute.xlu0 %228 }
  0xc2   :  { %v514_v38 = vmul.f32 %v389_v36, %v66_v34  ;;  %v482_v39 = vmul.f32 %v229_v37, %v34_v35  ;;  %v77_v36 = vld [vmem:[%s2022_s0 + $0x1d8] sm:$0xff] }
  0xc3   :  { %v45_v37 = vld [vmem:[%s2022_s0 + $0xd8] sm:$0xff] }
  0xc4   :  { %1357 = vmatprep.mubr.msk.f32.mxu0 %vm538_vm1, %v482_v39  ;;  %1405 = vmatprep.mubr.msk.f32.mxu1 %vm538_vm1, %v514_v38 }
  0xc5   :  { %v394_v42 = vpop.permute.xlu1 %393  ;;  %v234_v43 = vpop.permute.xlu0 %233 }
  0xc6   :  { %v515_v44 = vmul.f32 %v394_v42, %v67_v40  ;;  %v483_v45 = vmul.f32 %v234_v43, %v35_v41  ;;  %v78_v42 = vld [vmem:[%s2022_s0 + $0x1e0] sm:$0xff] }
  0xc7   :  { %v46_v43 = vld [vmem:[%s2022_s0 + $0xe0] sm:$0xff] }
  0xc8   :  { %1358 = vmatmul.mubr.msk.f32.gmra.mrb[16].mxu0 %vm538_vm1, %v483_v45  ;;  %1406 = vmatmul.mubr.msk.f32.gmra.mrb[16].mxu1 %vm538_vm1, %v515_v44 }
  0xc9   :  { %v399_v48 = vpop.permute.xlu1 %398  ;;  %v239_v49 = vpop.permute.xlu0 %238 }
  0xca   :  { %v516_v50 = vmul.f32 %v399_v48, %v68_v46  ;;  %v484_v51 = vmul.f32 %v239_v49, %v36_v47  ;;  %v79_v48 = vld [vmem:[%s2022_s0 + $0x1e8] sm:$0xff] }
  0xcb   :  { %v47_v49 = vld [vmem:[%s2022_s0 + $0xe8] sm:$0xff] }
  0xcc   :  { %1360 = vmatprep.mubr.msk.f32.mxu0 %vm538_vm1, %v484_v51  ;;  %1408 = vmatprep.mubr.msk.f32.mxu1 %vm538_vm1, %v516_v50 }
  0xcd   :  { %v404_v54 = vpop.permute.xlu1 %403  ;;  %v244_v55 = vpop.permute.xlu0 %243 }
  0xce   :  { %v517_v56 = vmul.f32 %v404_v54, %v69_v52  ;;  %v485_v57 = vmul.f32 %v244_v55, %v37_v53  ;;  %v80_v54 = vld [vmem:[%s2022_s0 + $0x1f0] sm:$0xff] }
  0xcf   :  { %v48_v55 = vld [vmem:[%s2022_s0 + $0xf0] sm:$0xff] }
  0xd0   :  { %1361 = vmatmul.mubr.msk.f32.gmra.mrb[18].mxu0 %vm538_vm1, %v485_v57  ;;  %1409 = vmatmul.mubr.msk.f32.gmra.mrb[18].mxu1 %vm538_vm1, %v517_v56 }
  0xd1   :  { %v409_v60 = vpop.permute.xlu1 %408  ;;  %v249_v61 = vpop.permute.xlu0 %248 }
  0xd2   :  { %v518_v62 = vmul.f32 %v409_v60, %v70_v58  ;;  %v486_v63 = vmul.f32 %v249_v61, %v38_v59  ;;  %v81_v60 = vld [vmem:[%s2022_s0 + $0x1f8] sm:$0xff] }
  0xd3   :  { %v49_v61 = vld [vmem:[%s2022_s0 + $0xf8] sm:$0xff]  ;;  %s1462_s0 = smov [#allocation2]  }
  0xd4   :  { %1363 = vmatprep.mubr.msk.f32.mxu0 %vm538_vm1, %v486_v63  ;;  %1411 = vmatprep.mubr.msk.f32.mxu1 %vm538_vm1, %v518_v62 }
  0xd5   :  { %v414_v2 = vpop.permute.xlu1 %413  ;;  %v254_v3 = vpop.permute.xlu0 %253 }
  0xd6   :  { %v519_v4 = vmul.f32 %v414_v2, %v71_v0  ;;  %v487_v5 = vmul.f32 %v254_v3, %v39_v1  ;;  %v1944_v2 = vld [vmem:[%s2025_s3] ss:$0 sm:$0xff]  ;;  %s1189_s3 = sshll.u32 %s1462_s0, 4  ;;  %s1190_s3 = int_to_ptr.vmem [resolvable:$true] %s1189_s3 }
  0xd7   :  { %s1437_s27 = scalar_lea.vmem %s1190_s3, 8192  ;;  %p1442_p1 = scmp.lt.s32.totalorder %s1190_s3, %s1190_s3 }
  0xd8   :  { %1364 = vmatmul.mubr.msk.f32.gmra.mrb[20].mxu0 %vm538_vm1, %v487_v5  ;;  %1412 = vmatmul.mubr.msk.f32.gmra.mrb[20].mxu1 %vm538_vm1, %v519_v4  ;;  %p1438_p0 = scmp.ne.s32.totalorder %s1190_s3, %s1437_s27  ;;  %p1443_p2 = scmp.lt.s32.totalorder %s1437_s27, %s1437_s27 }
  0xd9   :  { %v419_v8 = vpop.permute.xlu1 %418  ;;  %v259_v9 = vpop.permute.xlu0 %258 }
  0xda   :  { %v520_v10 = vmul.f32 %v419_v8, %v72_v6  ;;  %v488_v11 = vmul.f32 %v259_v9, %v40_v7  ;;  %p1444_p3 = por %p1443_p2, %p1442_p1 }
  0xdc   :  { %1366 = vmatprep.mubr.msk.f32.mxu0 %vm538_vm1, %v488_v11  ;;  %1414 = vmatprep.mubr.msk.f32.mxu1 %vm538_vm1, %v520_v10  ;;  %p1445_p4 = pnand %p1444_p3, %p1438_p0 }
  0xdd   :  { %v424_v14 = vpop.permute.xlu1 %423  ;;  %v264_v15 = vpop.permute.xlu0 %263 }
  0xde   :  { %v521_v16 = vmul.f32 %v424_v14, %v73_v12  ;;  %v489_v17 = vmul.f32 %v264_v15, %v41_v13 }
  0xe0   :  { %1367 = vmatmul.mubr.msk.f32.gmra.mrb[22].mxu0 %vm538_vm1, %v489_v17  ;;  %1415 = vmatmul.mubr.msk.f32.gmra.mrb[22].mxu1 %vm538_vm1, %v521_v16 }
  0xe1   :  { %v429_v20 = vpop.permute.xlu1 %428  ;;  %v269_v21 = vpop.permute.xlu0 %268 }
  0xe2   :  { %v522_v22 = vmul.f32 %v429_v20, %v74_v18  ;;  %v490_v23 = vmul.f32 %v269_v21, %v42_v19 }
  0xe4   :  { %1369 = vmatprep.mubr.msk.f32.mxu0 %vm538_vm1, %v490_v23  ;;  %1417 = vmatprep.mubr.msk.f32.mxu1 %vm538_vm1, %v522_v22 }
  0xe5   :  { %v434_v26 = vpop.permute.xlu1 %433  ;;  %v274_v27 = vpop.permute.xlu0 %273 }
  0xe6   :  { %v523_v28 = vmul.f32 %v434_v26, %v75_v24  ;;  %v491_v29 = vmul.f32 %v274_v27, %v43_v25 }
  0xe8   :  { %1370 = vmatmul.mubr.msk.f32.gmra.mrb[24].mxu0 %vm538_vm1, %v491_v29  ;;  %1418 = vmatmul.mubr.msk.f32.gmra.mrb[24].mxu1 %vm538_vm1, %v523_v28 }
  0xe9   :  { %v439_v32 = vpop.permute.xlu1 %438  ;;  %v279_v33 = vpop.permute.xlu0 %278 }
  0xea   :  { %v524_v34 = vmul.f32 %v439_v32, %v76_v30  ;;  %v492_v35 = vmul.f32 %v279_v33, %v44_v31 }
  0xec   :  { %1372 = vmatprep.mubr.msk.f32.mxu0 %vm538_vm1, %v492_v35  ;;  %1420 = vmatprep.mubr.msk.f32.mxu1 %vm538_vm1, %v524_v34 }
  0xed   :  { %v444_v38 = vpop.permute.xlu1 %443  ;;  %v284_v39 = vpop.permute.xlu0 %283 }
  0xee   :  { %v525_v40 = vmul.f32 %v444_v38, %v77_v36  ;;  %v493_v41 = vmul.f32 %v284_v39, %v45_v37 }
  0xf0   :  { %1373 = vmatmul.mubr.msk.f32.gmra.mrb[26].mxu0 %vm538_vm1, %v493_v41  ;;  %1421 = vmatmul.mubr.msk.f32.gmra.mrb[26].mxu1 %vm538_vm1, %v525_v40 }
  0xf1   :  { %v449_v44 = vpop.permute.xlu1 %448  ;;  %v289_v45 = vpop.permute.xlu0 %288 }
  0xf2   :  { %v526_v46 = vmul.f32 %v449_v44, %v78_v42  ;;  %v494_v47 = vmul.f32 %v289_v45, %v46_v43 }
  0xf4   :  { %1375 = vmatprep.mubr.msk.f32.mxu0 %vm538_vm1, %v494_v47  ;;  %1423 = vmatprep.mubr.msk.f32.mxu1 %vm538_vm1, %v526_v46 }
  0xf5   :  { %v454_v50 = vpop.permute.xlu1 %453  ;;  %v294_v51 = vpop.permute.xlu0 %293 }
  0xf6   :  { %v527_v52 = vmul.f32 %v454_v50, %v79_v48  ;;  %v495_v53 = vmul.f32 %v294_v51, %v47_v49 }
  0xf8   :  { %1376 = vmatmul.mubr.msk.f32.gmra.mrb[28].mxu0 %vm538_vm1, %v495_v53  ;;  %1424 = vmatmul.mubr.msk.f32.gmra.mrb[28].mxu1 %vm538_vm1, %v527_v52 }
  0xf9   :  { %v459_v56 = vpop.permute.xlu1 %458  ;;  %v299_v57 = vpop.permute.xlu0 %298 }
  0xfa   :  { %v528_v58 = vmul.f32 %v459_v56, %v80_v54  ;;  %v496_v59 = vmul.f32 %v299_v57, %v48_v55 }
  0xfc   :  { %1378 = vmatprep.mubr.msk.f32.mxu0 %vm538_vm1, %v496_v59  ;;  %1426 = vmatprep.mubr.msk.f32.mxu1 %vm538_vm1, %v528_v58 }
  0xfd   :  { %v464_v62 = vpop.permute.xlu1 %463  ;;  %v304_v63 = vpop.permute.xlu0 %303 }
  0xfe   :  { %v529_v0 = vmul.f32 %v464_v62, %v81_v60  ;;  %v497_v1 = vmul.f32 %v304_v63, %v49_v61 }
 0x100   :  { %1379 = vmatmul.mubr.msk.f32.gmra.mrb[30].mxu0 %vm538_vm1, %v497_v1  ;;  %1427 = vmatmul.mubr.msk.f32.gmra.mrb[30].mxu1 %vm538_vm1, %v529_v0 }
 0x158   :  { %v1335_v3 = vpop.f32.mrb[0].mxu0 }
 0x159   :  { %v807_v4 = vadd.f32 %v1335_v3, %v1944_v2  ;;  %v801_v5 = vpop.f32.mrb[1].mxu0 }
 0x15a   :  { %v802_v6 = vadd.f32 %v1944_v2, %v801_v5 }
 0x15b   :  { %1121 = vst [vmem:[#allocation2 + $0x8] sm:$0xff] %v807_v4 }
 0x15c   :  { %1120 = vst [vmem:[#allocation2] sm:$0xff] %v802_v6  ;;  %v1383_v7 = vpop.f32.mrb[0].mxu1 }
 0x15d   :  { %v967_v8 = vadd.f32 %v1383_v7, %v1944_v2  ;;  %v961_v9 = vpop.f32.mrb[1].mxu1 }
 0x15e   :  { %v962_v10 = vadd.f32 %v1944_v2, %v961_v9 }
 0x15f   :  { %1153 = vst [vmem:[#allocation2 + $0x108] sm:$0xff] %v967_v8 }
 0x160   :  { %1152 = vst [vmem:[#allocation2 + $0x100] sm:$0xff] %v962_v10 }
 0x163   :  { %v1338_v11 = vpop.f32.mrb[2].mxu0  ;;  %v1386_v12 = vpop.f32.mrb[2].mxu1 }
 0x164   :  { %v817_v13 = vadd.f32 %v1338_v11, %v1944_v2  ;;  %v977_v14 = vadd.f32 %v1386_v12, %v1944_v2  ;;  %v811_v15 = vpop.f32.mrb[3].mxu0  ;;  %v971_v16 = vpop.f32.mrb[3].mxu1 }
 0x165   :  { %v812_v17 = vadd.f32 %v1944_v2, %v811_v15  ;;  %v972_v18 = vadd.f32 %v1944_v2, %v971_v16 }
 0x166   :  { %1123 = vst [vmem:[#allocation2 + $0x18] sm:$0xff] %v817_v13  ;;  %1155 = vst [vmem:[#allocation2 + $0x118] sm:$0xff] %v977_v14 }
 0x167   :  { %1122 = vst [vmem:[#allocation2 + $0x10] sm:$0xff] %v812_v17  ;;  %1154 = vst [vmem:[#allocation2 + $0x110] sm:$0xff] %v972_v18 }
 0x16b   :  { %v1341_v19 = vpop.f32.mrb[4].mxu0  ;;  %v1389_v20 = vpop.f32.mrb[4].mxu1 }
 0x16c   :  { %v827_v21 = vadd.f32 %v1341_v19, %v1944_v2  ;;  %v987_v22 = vadd.f32 %v1389_v20, %v1944_v2  ;;  %v821_v23 = vpop.f32.mrb[5].mxu0  ;;  %v981_v24 = vpop.f32.mrb[5].mxu1 }
 0x16d   :  { %v822_v25 = vadd.f32 %v1944_v2, %v821_v23  ;;  %v982_v26 = vadd.f32 %v1944_v2, %v981_v24 }
 0x16e   :  { %1125 = vst [vmem:[#allocation2 + $0x28] sm:$0xff] %v827_v21  ;;  %1157 = vst [vmem:[#allocation2 + $0x128] sm:$0xff] %v987_v22 }
 0x16f   :  { %1124 = vst [vmem:[#allocation2 + $0x20] sm:$0xff] %v822_v25  ;;  %1156 = vst [vmem:[#allocation2 + $0x120] sm:$0xff] %v982_v26 }
 0x173   :  { %v1344_v27 = vpop.f32.mrb[6].mxu0  ;;  %v1392_v28 = vpop.f32.mrb[6].mxu1 }
 0x174   :  { %v837_v29 = vadd.f32 %v1344_v27, %v1944_v2  ;;  %v997_v30 = vadd.f32 %v1392_v28, %v1944_v2  ;;  %v831_v31 = vpop.f32.mrb[7].mxu0  ;;  %v991_v32 = vpop.f32.mrb[7].mxu1 }
 0x175   :  { %v832_v33 = vadd.f32 %v1944_v2, %v831_v31  ;;  %v992_v34 = vadd.f32 %v1944_v2, %v991_v32 }
 0x176   :  { %1127 = vst [vmem:[#allocation2 + $0x38] sm:$0xff] %v837_v29  ;;  %1159 = vst [vmem:[#allocation2 + $0x138] sm:$0xff] %v997_v30 }
 0x177   :  { %1126 = vst [vmem:[#allocation2 + $0x30] sm:$0xff] %v832_v33  ;;  %1158 = vst [vmem:[#allocation2 + $0x130] sm:$0xff] %v992_v34 }
 0x17b   :  { %v1347_v35 = vpop.f32.mrb[8].mxu0  ;;  %v1395_v36 = vpop.f32.mrb[8].mxu1 }
 0x17c   :  { %v847_v37 = vadd.f32 %v1347_v35, %v1944_v2  ;;  %v1007_v38 = vadd.f32 %v1395_v36, %v1944_v2  ;;  %v841_v39 = vpop.f32.mrb[9].mxu0  ;;  %v1001_v40 = vpop.f32.mrb[9].mxu1 }
 0x17d   :  { %v842_v41 = vadd.f32 %v1944_v2, %v841_v39  ;;  %v1002_v42 = vadd.f32 %v1944_v2, %v1001_v40 }
 0x17e   :  { %1129 = vst [vmem:[#allocation2 + $0x48] sm:$0xff] %v847_v37  ;;  %1161 = vst [vmem:[#allocation2 + $0x148] sm:$0xff] %v1007_v38 }
 0x17f   :  { %1128 = vst [vmem:[#allocation2 + $0x40] sm:$0xff] %v842_v41  ;;  %1160 = vst [vmem:[#allocation2 + $0x140] sm:$0xff] %v1002_v42 }
 0x183   :  { %v1350_v43 = vpop.f32.mrb[10].mxu0  ;;  %v1398_v44 = vpop.f32.mrb[10].mxu1 }
 0x184   :  { %v857_v45 = vadd.f32 %v1350_v43, %v1944_v2  ;;  %v1017_v46 = vadd.f32 %v1398_v44, %v1944_v2  ;;  %v851_v47 = vpop.f32.mrb[11].mxu0  ;;  %v1011_v48 = vpop.f32.mrb[11].mxu1 }
 0x185   :  { %v852_v49 = vadd.f32 %v1944_v2, %v851_v47  ;;  %v1012_v50 = vadd.f32 %v1944_v2, %v1011_v48 }
 0x186   :  { %1131 = vst [vmem:[#allocation2 + $0x58] sm:$0xff] %v857_v45  ;;  %1163 = vst [vmem:[#allocation2 + $0x158] sm:$0xff] %v1017_v46 }
 0x187   :  { %1130 = vst [vmem:[#allocation2 + $0x50] sm:$0xff] %v852_v49  ;;  %1162 = vst [vmem:[#allocation2 + $0x150] sm:$0xff] %v1012_v50 }
 0x18b   :  { %v1353_v51 = vpop.f32.mrb[12].mxu0  ;;  %v1401_v52 = vpop.f32.mrb[12].mxu1 }
 0x18c   :  { %v867_v53 = vadd.f32 %v1353_v51, %v1944_v2  ;;  %v1027_v54 = vadd.f32 %v1401_v52, %v1944_v2  ;;  %v861_v55 = vpop.f32.mrb[13].mxu0  ;;  %v1021_v56 = vpop.f32.mrb[13].mxu1 }
 0x18d   :  { %v862_v57 = vadd.f32 %v1944_v2, %v861_v55  ;;  %v1022_v58 = vadd.f32 %v1944_v2, %v1021_v56 }
 0x18e   :  { %1133 = vst [vmem:[#allocation2 + $0x68] sm:$0xff] %v867_v53  ;;  %1165 = vst [vmem:[#allocation2 + $0x168] sm:$0xff] %v1027_v54 }
 0x18f   :  { %1132 = vst [vmem:[#allocation2 + $0x60] sm:$0xff] %v862_v57  ;;  %1164 = vst [vmem:[#allocation2 + $0x160] sm:$0xff] %v1022_v58 }
 0x193   :  { %v1356_v59 = vpop.f32.mrb[14].mxu0  ;;  %v1404_v60 = vpop.f32.mrb[14].mxu1 }
 0x194   :  { %v877_v61 = vadd.f32 %v1356_v59, %v1944_v2  ;;  %v1037_v62 = vadd.f32 %v1404_v60, %v1944_v2  ;;  %v871_v63 = vpop.f32.mrb[15].mxu0  ;;  %v1031_v0 = vpop.f32.mrb[15].mxu1 }
 0x195   :  { %v872_v1 = vadd.f32 %v1944_v2, %v871_v63  ;;  %v1032_v3 = vadd.f32 %v1944_v2, %v1031_v0 }
 0x196   :  { %1135 = vst [vmem:[#allocation2 + $0x78] sm:$0xff] %v877_v61  ;;  %1167 = vst [vmem:[#allocation2 + $0x178] sm:$0xff] %v1037_v62 }
 0x197   :  { %1134 = vst [vmem:[#allocation2 + $0x70] sm:$0xff] %v872_v1  ;;  %1166 = vst [vmem:[#allocation2 + $0x170] sm:$0xff] %v1032_v3 }
 0x19b   :  { %v1359_v4 = vpop.f32.mrb[16].mxu0  ;;  %v1407_v5 = vpop.f32.mrb[16].mxu1 }
 0x19c   :  { %v887_v6 = vadd.f32 %v1359_v4, %v1944_v2  ;;  %v1047_v7 = vadd.f32 %v1407_v5, %v1944_v2  ;;  %v881_v8 = vpop.f32.mrb[17].mxu0  ;;  %v1041_v9 = vpop.f32.mrb[17].mxu1 }
 0x19d   :  { %v882_v10 = vadd.f32 %v1944_v2, %v881_v8  ;;  %v1042_v11 = vadd.f32 %v1944_v2, %v1041_v9 }
 0x19e   :  { %1137 = vst [vmem:[#allocation2 + $0x88] sm:$0xff] %v887_v6  ;;  %1169 = vst [vmem:[#allocation2 + $0x188] sm:$0xff] %v1047_v7 }
 0x19f   :  { %1136 = vst [vmem:[#allocation2 + $0x80] sm:$0xff] %v882_v10  ;;  %1168 = vst [vmem:[#allocation2 + $0x180] sm:$0xff] %v1042_v11 }
 0x1a3   :  { %v1362_v12 = vpop.f32.mrb[18].mxu0  ;;  %v1410_v13 = vpop.f32.mrb[18].mxu1 }
 0x1a4   :  { %v897_v14 = vadd.f32 %v1362_v12, %v1944_v2  ;;  %v1057_v15 = vadd.f32 %v1410_v13, %v1944_v2  ;;  %v891_v16 = vpop.f32.mrb[19].mxu0  ;;  %v1051_v17 = vpop.f32.mrb[19].mxu1 }
 0x1a5   :  { %v892_v18 = vadd.f32 %v1944_v2, %v891_v16  ;;  %v1052_v19 = vadd.f32 %v1944_v2, %v1051_v17 }
 0x1a6   :  { %1139 = vst [vmem:[#allocation2 + $0x98] sm:$0xff] %v897_v14  ;;  %1171 = vst [vmem:[#allocation2 + $0x198] sm:$0xff] %v1057_v15 }
 0x1a7   :  { %1138 = vst [vmem:[#allocation2 + $0x90] sm:$0xff] %v892_v18  ;;  %1170 = vst [vmem:[#allocation2 + $0x190] sm:$0xff] %v1052_v19 }
 0x1ab   :  { %v1365_v20 = vpop.f32.mrb[20].mxu0  ;;  %v1413_v21 = vpop.f32.mrb[20].mxu1 }
 0x1ac   :  { %v907_v22 = vadd.f32 %v1365_v20, %v1944_v2  ;;  %v1067_v23 = vadd.f32 %v1413_v21, %v1944_v2  ;;  %v901_v24 = vpop.f32.mrb[21].mxu0  ;;  %v1061_v25 = vpop.f32.mrb[21].mxu1 }
 0x1ad   :  { %v902_v26 = vadd.f32 %v1944_v2, %v901_v24  ;;  %v1062_v27 = vadd.f32 %v1944_v2, %v1061_v25 }
 0x1ae   :  { %1141 = vst [vmem:[#allocation2 + $0xa8] sm:$0xff] %v907_v22  ;;  %1173 = vst [vmem:[#allocation2 + $0x1a8] sm:$0xff] %v1067_v23 }
 0x1af   :  { %1140 = vst [vmem:[#allocation2 + $0xa0] sm:$0xff] %v902_v26  ;;  %1172 = vst [vmem:[#allocation2 + $0x1a0] sm:$0xff] %v1062_v27 }
 0x1b3   :  { %v1368_v28 = vpop.f32.mrb[22].mxu0  ;;  %v1416_v29 = vpop.f32.mrb[22].mxu1 }
 0x1b4   :  { %v917_v30 = vadd.f32 %v1368_v28, %v1944_v2  ;;  %v1077_v31 = vadd.f32 %v1416_v29, %v1944_v2  ;;  %v911_v32 = vpop.f32.mrb[23].mxu0  ;;  %v1071_v33 = vpop.f32.mrb[23].mxu1 }
 0x1b5   :  { %v912_v34 = vadd.f32 %v1944_v2, %v911_v32  ;;  %v1072_v35 = vadd.f32 %v1944_v2, %v1071_v33 }
 0x1b6   :  { %1143 = vst [vmem:[#allocation2 + $0xb8] sm:$0xff] %v917_v30  ;;  %1175 = vst [vmem:[#allocation2 + $0x1b8] sm:$0xff] %v1077_v31 }
 0x1b7   :  { %1142 = vst [vmem:[#allocation2 + $0xb0] sm:$0xff] %v912_v34  ;;  %1174 = vst [vmem:[#allocation2 + $0x1b0] sm:$0xff] %v1072_v35 }
 0x1bb   :  { %v1371_v36 = vpop.f32.mrb[24].mxu0  ;;  %v1419_v37 = vpop.f32.mrb[24].mxu1 }
 0x1bc   :  { %v927_v38 = vadd.f32 %v1371_v36, %v1944_v2  ;;  %v1087_v39 = vadd.f32 %v1419_v37, %v1944_v2  ;;  %v921_v40 = vpop.f32.mrb[25].mxu0  ;;  %v1081_v41 = vpop.f32.mrb[25].mxu1 }
 0x1bd   :  { %v922_v42 = vadd.f32 %v1944_v2, %v921_v40  ;;  %v1082_v43 = vadd.f32 %v1944_v2, %v1081_v41 }
 0x1be   :  { %1145 = vst [vmem:[#allocation2 + $0xc8] sm:$0xff] %v927_v38  ;;  %1177 = vst [vmem:[#allocation2 + $0x1c8] sm:$0xff] %v1087_v39 }
 0x1bf   :  { %1144 = vst [vmem:[#allocation2 + $0xc0] sm:$0xff] %v922_v42  ;;  %1176 = vst [vmem:[#allocation2 + $0x1c0] sm:$0xff] %v1082_v43 }
 0x1c3   :  { %v1374_v44 = vpop.f32.mrb[26].mxu0  ;;  %v1422_v45 = vpop.f32.mrb[26].mxu1 }
 0x1c4   :  { %v937_v46 = vadd.f32 %v1374_v44, %v1944_v2  ;;  %v1097_v47 = vadd.f32 %v1422_v45, %v1944_v2  ;;  %v931_v48 = vpop.f32.mrb[27].mxu0  ;;  %v1091_v49 = vpop.f32.mrb[27].mxu1 }
 0x1c5   :  { %v932_v50 = vadd.f32 %v1944_v2, %v931_v48  ;;  %v1092_v51 = vadd.f32 %v1944_v2, %v1091_v49 }
 0x1c6   :  { %1147 = vst [vmem:[#allocation2 + $0xd8] sm:$0xff] %v937_v46  ;;  %1179 = vst [vmem:[#allocation2 + $0x1d8] sm:$0xff] %v1097_v47 }
 0x1c7   :  { %1146 = vst [vmem:[#allocation2 + $0xd0] sm:$0xff] %v932_v50  ;;  %1178 = vst [vmem:[#allocation2 + $0x1d0] sm:$0xff] %v1092_v51 }
 0x1cb   :  { %v1377_v52 = vpop.f32.mrb[28].mxu0  ;;  %v1425_v53 = vpop.f32.mrb[28].mxu1 }
 0x1cc   :  { %v947_v54 = vadd.f32 %v1377_v52, %v1944_v2  ;;  %v1107_v55 = vadd.f32 %v1425_v53, %v1944_v2  ;;  %v941_v56 = vpop.f32.mrb[29].mxu0  ;;  %v1101_v57 = vpop.f32.mrb[29].mxu1 }
 0x1cd   :  { %v942_v58 = vadd.f32 %v1944_v2, %v941_v56  ;;  %v1102_v59 = vadd.f32 %v1944_v2, %v1101_v57 }
 0x1ce   :  { %1149 = vst [vmem:[#allocation2 + $0xe8] sm:$0xff] %v947_v54  ;;  %1181 = vst [vmem:[#allocation2 + $0x1e8] sm:$0xff] %v1107_v55 }
 0x1cf   :  { %1148 = vst [vmem:[#allocation2 + $0xe0] sm:$0xff] %v942_v58  ;;  %1180 = vst [vmem:[#allocation2 + $0x1e0] sm:$0xff] %v1102_v59 }
 0x1d3   :  { %v1380_v60 = vpop.f32.mrb[30].mxu0  ;;  %v1428_v61 = vpop.f32.mrb[30].mxu1 }
 0x1d4   :  { %v957_v62 = vadd.f32 %v1380_v60, %v1944_v2  ;;  %v1117_v63 = vadd.f32 %v1428_v61, %v1944_v2  ;;  %v951_v0 = vpop.f32.mrb[31].mxu0  ;;  %v1111_v1 = vpop.f32.mrb[31].mxu1 }
 0x1d5   :  { %v952_v3 = vadd.f32 %v1944_v2, %v951_v0  ;;  %v1112_v4 = vadd.f32 %v1944_v2, %v1111_v1 }
 0x1d6   :  { %1151 = vst [vmem:[#allocation2 + $0xf8] sm:$0xff] %v957_v62  ;;  %1183 = vst [vmem:[#allocation2 + $0x1f8] sm:$0xff] %v1117_v63 }
 0x1d7   :  { %1150 = vst [vmem:[#allocation2 + $0xf0] sm:$0xff] %v952_v3  ;;  %1182 = vst [vmem:[#allocation2 + $0x1f0] sm:$0xff] %v1112_v4 }
 0x1d8   :  { %1448 = shalt.err (!%p1445_p4)
}
 0x1d9   :  { %s1449_s30 = scalar_lea.hbm %s2026_s4, 8192 }
 0x1da   :  { %p1450_p5 = scmp.ne.s32.totalorder %s2026_s4, %s1449_s30  ;;  %p1453_p6 = scmp.lt.u32.totalorder %s1449_s30, %s2026_s4 }
 0x1dc   :  { %p1455_p7 = pnand %p1453_p6, %p1450_p5 }
 0x1de   :  { %1458 = shalt.err (!%p1455_p7)
}
 0x1df   :  { %s1463_s9 = smov 128   ;;  %s1464_s10 = smov 8  }
 0x1e0   :  { %1195 = dma.vmem_to_hbm [thread:$0]  %s1190_s3, 8192, %s2026_s4, [#allocation3], %s1463_s9, %s1463_s9, %s1464_s10  }
 0x1e1   :  { %1459 = dma.done.wait [#allocation3], 8192  }
 0x1e2   :  { %1460 = vsyncadd [#allocation3], 4294959104 }
 0x1e3   :  { %1199 = vsyncpa [#allocation3], 1 }

</bundles_post_ra>
